<compile_context>
chip_gen: v7x
topology: tpu7x:2x2x1
jax: 0.10.0
libtpu: 0.0.40
codegen_flags: <defaults>
</compile_context>

<pallas_src>
import functools

import jax
import jax.numpy as jnp
from jax.experimental import pallas as pl
from jax.experimental.pallas import tpu as pltpu


def _round_up(x: int, m: int) -> int:
    return ((x + m - 1) // m) * m


def _vmem_capacity_bytes() -> int:
    try:
        return int(pltpu.get_tpu_info().vmem_capacity_bytes)
    except Exception:
        return 64 * 1024 * 1024  # conservative (v7x per-core VMEM)


def _balanced_tile(dim: int, cap: int, align: int) -> int:
    """Largest tile <= cap (multiple of align) with minimal boundary waste."""
    nblocks = pl.cdiv(dim, cap)
    return min(cap, _round_up(pl.cdiv(dim, nblocks), align))


def _choose_k_tiling(k: int):
    """Pick (tk, Kp). K is only tiled (and padded) when it is large."""
    if k <= 1024:
        return k, k          # single K step, no padding needed anywhere
    tk = 512                 # 128-aligned reduction tile
    return tk, _round_up(k, tk)


# ---------------------------------------------------------------------------
# Kernels
# ---------------------------------------------------------------------------
def _linear_kernel_f32(x_ref, w_ref, b_ref, o_ref):
    """f32 output: accumulate directly into the resident output block."""
    k = pl.program_id(2)

    @pl.when(k == 0)
    def _init():
        # Fold the bias into the accumulator init (saves an epilogue pass).
        o_ref[...] = jnp.broadcast_to(b_ref[...].astype(o_ref.dtype), o_ref.shape)

    o_ref[...] += jnp.dot(
        x_ref[...], w_ref[...], preferred_element_type=jnp.float32
    )


def _linear_kernel_acc(x_ref, w_ref, b_ref, o_ref, acc_ref):
    """Low-precision output: f32 VMEM accumulator, cast in the epilogue."""
    k = pl.program_id(2)

    @pl.when(k == 0)
    def _init():
        acc_ref[...] = jnp.broadcast_to(
            b_ref[...].astype(jnp.float32), acc_ref.shape
        )

    acc_ref[...] += jnp.dot(
        x_ref[...], w_ref[...], preferred_element_type=jnp.float32
    )

    @pl.when(k == pl.num_programs(2) - 1)
    def _store():
        o_ref[...] = acc_ref[...].astype(o_ref.dtype)


# ---------------------------------------------------------------------------
# Forward wrapper
# ---------------------------------------------------------------------------
@functools.partial(jax.jit, static_argnames=("n_out", "tk"))
def _linear_forward(x, w_pad, b_pad, *, n_out, tk):
    """y = x @ w_pad + b_pad, restricted to the first n_out output columns.

    x:     (M, K)   activations (f32 or bf16)
    w_pad: (Kp, Np) pre-transposed, pre-padded weight (zeros in the pad)
    b_pad: (1, Np)  pre-padded bias
    Returns (M, n_out) in x.dtype.
    """
    M, K = x.shape
    Kp, Np = w_pad.shape
    N = n_out
    out_dtype = x.dtype
    sub = 16 if out_dtype == jnp.bfloat16 else 8

    # Only the K axis needs exact zero padding (reduction correctness); M and N
    # boundaries are handled with partial blocks whose garbage never reaches
    # in-bounds output.
    if Kp != K:
        x = jnp.pad(x, ((0, 0), (0, Kp - K)))

    # Balanced tiles (last block nearly full) capped at MXU-friendly sizes.
    tm = _balanced_tile(M, 512, sub)
    tn = _balanced_tile(N, 512, 128)

    # v7x megacore: if the parallel grid collapsed to one program, split N so
    # both TensorCores get work.
    if pl.cdiv(M, tm) * pl.cdiv(N, tn) == 1 and N >= 256:
        tn = _round_up(pl.cdiv(N, 2), 128)

    grid = (pl.cdiv(M, tm), pl.cdiv(N, tn), Kp // tk)

    if out_dtype == jnp.float32:
        kernel = _linear_kernel_f32
        scratch = []
    else:
        kernel = _linear_kernel_acc
        scratch = [pltpu.VMEM((tm, tn), jnp.float32)]

    vmem_limit = min((_vmem_capacity_bytes() * 3) // 4, 100 * 1024 * 1024)

    itemsize = x.dtype.itemsize
    cost = pl.CostEstimate(
        flops=2 * M * N * Kp,
        transcendentals=0,
        bytes_accessed=(M * Kp + Kp * Np + Np + M * N) * itemsize,
    )

    return pl.pallas_call(
        kernel,
        out_shape=jax.ShapeDtypeStruct((M, N), out_dtype),
        grid_spec=pltpu.PrefetchScalarGridSpec(
            num_scalar_prefetch=0,
            grid=grid,
            in_specs=[
                pl.BlockSpec((tm, tk), lambda i, j, k: (i, k)),  # x tile
                pl.BlockSpec((tk, tn), lambda i, j, k: (k, j)),  # weight tile
                pl.BlockSpec((1, tn), lambda i, j, k: (0, j)),   # bias row
            ],
            out_specs=pl.BlockSpec((tm, tn), lambda i, j, k: (i, j)),
            scratch_shapes=scratch,
        ),
        compiler_params=pltpu.CompilerParams(
            dimension_semantics=("parallel", "parallel", "arbitrary"),
            vmem_limit_bytes=int(vmem_limit),
        ),
        cost_estimate=cost,
    )(x, w_pad, b_pad)


# ---------------------------------------------------------------------------
# Module: matches nn.Sequential(nn.Linear(in_dim, out_dim)) + xavier_init
# ---------------------------------------------------------------------------
class LinearLayer:
    """Pallas-TPU equivalent of ROSMAP LinearLayer: y = x @ W^T + b."""

    def __init__(self, key, in_dim, out_dim, dtype=jnp.float32):
        # Xavier-normal weight (torch layout (out_dim, in_dim)), zero bias.
        std = (2.0 / (in_dim + out_dim)) ** 0.5
        weight = std * jax.random.normal(key, (out_dim, in_dim), dtype=dtype)
        bias = jnp.zeros((out_dim,), dtype=dtype)
        self.set_params(weight, bias)

    def set_params(self, weight, bias):
        """weight: (out_dim, in_dim) torch layout; bias: (out_dim,).

        Transposes and zero-pads ONCE so the hot path never touches the
        full weight for padding again.
        """
        out_dim, in_dim = weight.shape
        assert bias.shape == (out_dim,)
        self.weight = weight
        self.bias = bias
        self.in_dim, self.out_dim = in_dim, out_dim

        self.tk, kp = _choose_k_tiling(in_dim)
        np_ = _round_up(out_dim, 128)  # lane-aligned weight/bias columns

        w_t = jnp.zeros((kp, np_), weight.dtype).at[:in_dim, :out_dim].set(weight.T)
        b_p = jnp.zeros((1, np_), bias.dtype).at[0, :out_dim].set(bias)
        self.w_pad = w_t
        self.b_pad = b_p

    def __call__(self, x):
        return _linear_forward(
            x, self.w_pad, self.b_pad, n_out=self.out_dim, tk=self.tk
        )


if __name__ == "__main__":
    key = jax.random.PRNGKey(0)
    k1, k2, k3, kx1, kx2, kx3 = jax.random.split(key, 6)

    # 1) ROSMAP-like tiny layer: batch=8, in_dim=32, out_dim=16.
    layer1 = LinearLayer(k1, 32, 16)
    x1 = jax.random.normal(kx1, (8, 32), dtype=jnp.float32)
    y1 = jax.block_until_ready(layer1(x1))
    ref1 = x1 @ layer1.weight.T + layer1.bias
    assert y1.shape == (8, 16)
    assert jnp.allclose(y1, ref1, atol=1e-5, rtol=1e-5)

    # 2) Non-tile-aligned M / K / N with nonzero bias: exercises partial
    #    boundary blocks along M and N and the bias epilogue.
    layer2 = LinearLayer(k2, 200, 130)
    layer2.set_params(layer2.weight, layer2.bias + 0.5)
    x2 = jax.random.normal(kx2, (300, 200), dtype=jnp.float32)
    y2 = jax.block_until_ready(layer2(x2))
    ref2 = x2 @ layer2.weight.T + layer2.bias
    assert y2.shape == (300, 130)
    assert jnp.allclose(y2, ref2, atol=1e-4, rtol=1e-4)

    # 3) Large K: exercises K tiling, the per-call K zero-pad and the
    #    multi-step accumulation into the resident output block.
    layer3 = LinearLayer(k3, 1300, 128)
    x3 = jax.random.normal(kx3, (16, 1300), dtype=jnp.float32)
    y3 = jax.block_until_ready(layer3(x3))
    ref3 = x3 @ layer3.weight.T + layer3.bias
    assert y3.shape == (16, 128)
    assert jnp.allclose(y3, ref3, atol=1e-3, rtol=1e-3)

    print("KERNEL_OK")
</pallas_src>

<mosaic_0001>
module attributes {stable_mosaic.version = 11 : i64} {
  func.func @_linear_kernel_f32(%arg0: i32, %arg1: i32, %arg2: i32, %arg3: memref<8x32xf32, #tpu.memory_space<vmem>>, %arg4: memref<32x128xf32, #tpu.memory_space<vmem>>, %arg5: memref<1x128xf32, #tpu.memory_space<vmem>>, %arg6: memref<8x128xf32, #tpu.memory_space<vmem>>) attributes {dimension_semantics = [#tpu.dimension_semantics<parallel>, #tpu.dimension_semantics<parallel>, #tpu.dimension_semantics<arbitrary>], iteration_bounds = array<i64: 1, 1, 1>, scalar_prefetch = 0 : i64, scratch_operands = 0 : i64, tpu.core_type = #tpu.core_type<tc>, window_params = [{transform_indices = @transform_0, window_bounds = array<i64: 8, 32>}, {transform_indices = @transform_1, window_bounds = array<i64: 32, 128>}, {transform_indices = @transform_2, window_bounds = array<i64: 1, 128>}, {transform_indices = @transform_3, window_bounds = array<i64: 8, 128>}]} {
    %c0_i32 = arith.constant 0 : i32
    %0 = arith.cmpi eq, %arg2, %c0_i32 : i32
    %1 = arith.extui %0 : i1 to i32
    %c0_i32_0 = arith.constant 0 : i32
    %2 = arith.cmpi ne, %1, %c0_i32_0 : i32
    scf.if %2 {
      %c0_8 = arith.constant 0 : index
      %c0_9 = arith.constant 0 : index
      %9 = vector.load %arg5[%c0_8, %c0_9] : memref<1x128xf32, #tpu.memory_space<vmem>>, vector<1x128xf32>
      %10 = vector.shape_cast %9 : vector<1x128xf32> to vector<1x128xf32>
      %11 = vector.broadcast %10 : vector<1x128xf32> to vector<8x128xf32>
      %c0_10 = arith.constant 0 : index
      %c0_11 = arith.constant 0 : index
      %12 = vector.load %arg6[%c0_10, %c0_11] : memref<8x128xf32, #tpu.memory_space<vmem>>, vector<8x128xf32>
      tpu.vector_store %arg6[%c0_10, %c0_11], %11 {strides = array<i32>} : memref<8x128xf32, #tpu.memory_space<vmem>>, vector<8x128xf32>,
    } else {
    }
    %c0 = arith.constant 0 : index
    %c0_1 = arith.constant 0 : index
    %3 = vector.load %arg6[%c0, %c0_1] : memref<8x128xf32, #tpu.memory_space<vmem>>, vector<8x128xf32>
    %c0_2 = arith.constant 0 : index
    %c0_3 = arith.constant 0 : index
    %4 = vector.load %arg3[%c0_2, %c0_3] : memref<8x32xf32, #tpu.memory_space<vmem>>, vector<8x32xf32>
    %c0_4 = arith.constant 0 : index
    %c0_5 = arith.constant 0 : index
    %5 = vector.load %arg4[%c0_4, %c0_5] : memref<32x128xf32, #tpu.memory_space<vmem>>, vector<32x128xf32>
    %cst = arith.constant dense<0.000000e+00> : vector<8x128xf32>
    %6 = tpu.matmul %4, %5, %cst {dimension_numbers = #tpu.dot_dimension_numbers<[1], [0], [0], [1], [0, 0, 1, 1], [], []>} : vector<8x32xf32>, vector<32x128xf32>, vector<8x128xf32> -> vector<8x128xf32>
    %7 = arith.addf %3, %6 : vector<8x128xf32>
    %c0_6 = arith.constant 0 : index
    %c0_7 = arith.constant 0 : index
    %8 = vector.load %arg6[%c0_6, %c0_7] : memref<8x128xf32, #tpu.memory_space<vmem>>, vector<8x128xf32>
    tpu.vector_store %arg6[%c0_6, %c0_7], %7 {strides = array<i32>} : memref<8x128xf32, #tpu.memory_space<vmem>>, vector<8x128xf32>,
    return
  }
  func.func @transform_0(%arg0: i32, %arg1: i32, %arg2: i32) -> (i32, i32) {
    %c0_i32 = arith.constant 0 : i32
    return %arg0, %arg2 : i32, i32
  }
  func.func @transform_1(%arg0: i32, %arg1: i32, %arg2: i32) -> (i32, i32) {
    %c0_i32 = arith.constant 0 : i32
    return %arg2, %arg1 : i32, i32
  }
  func.func @transform_2(%arg0: i32, %arg1: i32, %arg2: i32) -> (i32, i32) {
    %c0_i32 = arith.constant 0 : i32
    %c0_i32_0 = arith.constant 0 : i32
    return %c0_i32, %arg1 : i32, i32
  }
  func.func @transform_3(%arg0: i32, %arg1: i32, %arg2: i32) -> (i32, i32) {
    %c0_i32 = arith.constant 0 : i32
    return %arg0, %arg1 : i32, i32
  }
}

</mosaic_0001>

<bundles_post_ra>
// kernel: _linear_forward.1
= control target key start
LH: loop header
LB: loop body
LE: loop exit
PB: predicated region body
PF: predicated region fallthrough
CT: control target
= control target key end

     0   :  { %8 = vsyncpa [#allocation3], 0  ;;  %s329_s0 = inlined_call_operand.hbm [shape: f32[8,32], index: 0, kind: input, shape index: {}]   ;;  %s330_s1 = inlined_call_operand.hbm [shape: f32[32,128], index: 1, kind: input, shape index: {}]   ;;  %s331_s2 = inlined_call_operand.vmem [shape: f32[1,128], index: 2, kind: input, shape index: {}]   ;;  %s332_s3 = inlined_call_operand.hbm [shape: f32[8,16], index: 3, kind: output, shape index: {}]  }
   0x1   :  { %9 = vsyncpa [#allocation6], 0 }
   0x2   :  { %10 = vsyncpa [#allocation4], 0  ;;  %s255_s12 = smov [#allocation2]   ;;  %s256_s14 = smov [#allocation5]  }
   0x3   :  { %s17_s13 = sshll.u32 %s255_s12, 4  ;;  %s26_s15 = sshll.u32 %s256_s14, 4  ;;  %s18_s13 = int_to_ptr.vmem [resolvable:$true] %s17_s13  ;;  %s283_s15 = int_to_ptr.vmem [resolvable:$true] %s26_s15 }
   0x4   :  { %s183_s18 = scalar_lea.hbm %s329_s0, 128 }
   0x5   :  { %p184_p0 = scmp.ne.s32.totalorder %s329_s0, %s183_s18  ;;  %p187_p1 = scmp.lt.u32.totalorder %s183_s18, %s329_s0 }
   0x7   :  { %p189_p2 = pnand %p187_p1, %p184_p0 }
   0x9   :  { %192 = shalt.err (!%p189_p2)
}
   0xa   :  { %s193_s23 = scalar_lea.vmem %s18_s13, 128  ;;  %p198_p4 = scmp.lt.s32.totalorder %s18_s13, %s18_s13 }
   0xb   :  { %p194_p3 = scmp.ne.s32.totalorder %s18_s13, %s193_s23  ;;  %p199_p5 = scmp.lt.s32.totalorder %s193_s23, %s193_s23 }
   0xd   :  { %p200_p6 = por %p199_p5, %p198_p4 }
   0xf   :  { %p201_p7 = pnand %p200_p6, %p194_p3 }
  0x11   :  { %204 = shalt.err (!%p201_p7)
}
  0x12   :  { %20 = dma.hbm_to_vmem [thread:$0]  %s329_s0, 128, %s18_s13, [#allocation3]  }
  0x13   :  { %s205_s28 = scalar_lea.hbm %s330_s1, 512 }
  0x14   :  { %p206_p8 = scmp.ne.s32.totalorder %s330_s1, %s205_s28  ;;  %p209_p9 = scmp.lt.u32.totalorder %s205_s28, %s330_s1 }
  0x16   :  { %p211_p10 = pnand %p209_p9, %p206_p8 }
  0x18   :  { %214 = shalt.err (!%p211_p10)
}
  0x19   :  { %s215_s6 = scalar_lea.vmem %s283_s15, 512  ;;  %p220_p12 = scmp.lt.s32.totalorder %s283_s15, %s283_s15 }
  0x1a   :  { %p216_p11 = scmp.ne.s32.totalorder %s283_s15, %s215_s6  ;;  %p221_p13 = scmp.lt.s32.totalorder %s215_s6, %s215_s6 }
  0x1c   :  { %p222_p0 = por %p221_p13, %p220_p12 }
  0x1e   :  { %p223_p1 = pnand %p222_p0, %p216_p11 }
  0x20   :  { %226 = shalt.err (!%p223_p1)
}
  0x21   :  { %s257_s0 = smov 128   ;;  %s258_s7 = smov 8  }
  0x22   :  { %32 = dma.hbm_to_vmem [thread:$0]  %s330_s1, 512, %s283_s15, [#allocation6], %s257_s0, %s257_s0, %s258_s7  }
  0x23   :  { %249 = dma.done.wait [#allocation3], 128  }
  0x24   :  { %250 = vsyncadd [#allocation3], 4294967168 }
  0x25   :  { %251 = dma.done.wait [#allocation6], 512  }
  0x26   :  { %252 = vsyncadd [#allocation6], 4294966784  ;;  %v259_v0 = vmov 0.0|0.0   ;;  %vm260_vm0 = vmmov 0   ;;  %v261_v1 = vmov 0.0   ;;  %v55_v2 = vld [vmem:[#allocation5] sm:$0xff] }
  0x27   :  { %169 = vmatprep.subr.bf16.mxu0 %v259_v0  ;;  %166 = vmatprep.mubr.msk.f32.mxu0 %vm260_vm0, %v261_v1  ;;  %v56_v3 = vld [vmem:[#allocation5 + $0x8] sm:$0xff]  ;;  %v57_v5 = vld [vmem:[#allocation5 + $0x10] sm:$0xff]  ;;  %v58_v6 = vld [vmem:[#allocation5 + $0x18] sm:$0xff]  ;;  %vm59_vm1 = vcmask 261120   ;;  %s262_s11 = smov [#allocation7]  }
  0x28   :  { %v170_v4 = vpack.c.bf16 %v56_v3, %v55_v2  ;;  %v173_v7 = vpack.c.bf16 %v58_v6, %v57_v5  ;;  %v54_v8 = vld [vmem:[#allocation2] sm:$0xff]  ;;  %s141_s12 = sshll.u32 %s262_s11, 4  ;;  %s142_s12 = int_to_ptr.vmem [resolvable:$true] %s141_s12 }
  0x29   :  { %v151_v9 = vld [vmem:[%s331_s2] ss:$0 sm:$0xff]  ;;  %s227_s13 = scalar_lea.vmem %s142_s12, 128  ;;  %p232_p3 = scmp.lt.s32.totalorder %s142_s12, %s142_s12 }
  0x2a   :  { %171 = vmatpush3.bf16.msra.mxu0 %v170_v4  ;;  %p228_p2 = scmp.ne.s32.totalorder %s142_s12, %s227_s13  ;;  %p233_p4 = scmp.lt.s32.totalorder %s227_s13, %s227_s13 }
  0x2b   :  { %172 = vmatprep.subr.bf16.mxu0 %v259_v0 }
  0x2c   :  { %p234_p5 = por %p233_p4, %p232_p3 }
  0x2e   :  { %174 = vmatpush3.bf16.msra.mxu0 %v173_v7  ;;  %p235_p6 = pnand %p234_p5, %p228_p2 }
  0x31   :  { %167 = vmatmul.mubr.msk.f32.vlgmr.msra.gmra.mrb[0].mxu0 %vm59_vm1, %v54_v8 }
 0x104   :  { %v129_v10 = vpop.f32.mrb[0].mxu0 }
 0x105   :  { %v133_v11 = vadd.f32 %v151_v9, %v129_v10  ;;  %v168_v12 = vpop.f32.mrb[1].mxu0 }
 0x107   :  { %134 = vst [vmem:[#allocation7] sm:$0xff] %v133_v11 }
 0x108   :  { %238 = shalt.err (!%p235_p6)
}
 0x109   :  { %s239_s16 = scalar_lea.hbm %s332_s3, 128 }
 0x10a   :  { %p240_p7 = scmp.ne.s32.totalorder %s332_s3, %s239_s16  ;;  %p243_p8 = scmp.lt.u32.totalorder %s239_s16, %s332_s3 }
 0x10c   :  { %p245_p9 = pnand %p243_p8, %p240_p7 }
 0x10e   :  { %248 = shalt.err (!%p245_p9)
}
 0x10f   :  { %144 = dma.vmem_to_hbm [thread:$0]  %s142_s12, 128, %s332_s3, [#allocation4]  }
 0x110   :  { %253 = dma.done.wait [#allocation4], 128  }
 0x111   :  { %254 = vsyncadd [#allocation4], 4294967168 }
 0x112   :  { %148 = vsyncpa [#allocation3], 1 }
 0x113   :  { %149 = vsyncpa [#allocation6], 1 }
 0x114   :  { %150 = vsyncpa [#allocation4], 1 }

</bundles_post_ra>
